<compile_context>
chip_gen: v7x
topology: tpu7x:2x2x1
jax: 0.10.0
libtpu: 0.0.40
codegen_flags: <defaults>
</compile_context>

<pallas_src>
import functools

import jax
import jax.numpy as jnp
from jax.experimental import pallas as pl
from jax.experimental.pallas import tpu as pltpu

LANE = 128
# Generation-safe VMEM sizing: 36 MiB of pipeline buffers (=> ~9-18 MiB per
# input buffer, so per-grid-step time dwarfs the ~0.35 us step overhead on
# v5e/v6e/v7x) under a 48 MiB declared limit -- above the 16/32 MiB scoped
# defaults on v5e/v6e, with headroom below v7x's 64 MiB physical VMEM.
_VMEM_LIMIT_BYTES = 48 * 1024 * 1024
_BLOCK_BUDGET_BYTES = 36 * 1024 * 1024


def _cdiv(a, b):
    return -(-a // b)


def _round_up(a, b):
    return _cdiv(a, b) * b


def _gap_reduce_kernel(x_ref, o_ref, acc_ref, *, hw, hw_tile, inv_hw, needs_mask):
    """Sum-reduce the hw (lane) axis across the innermost (arbitrary) grid axis.

    x_ref  : (row_tile, hw_tile) input block in VMEM
    o_ref  : (row_tile, 1) output block (written on the last hw chunk)
    acc_ref: (row_tile, 1) f32 accumulator scratch, persists across the hw axis
    """
    k = pl.program_id(1)
    nk = pl.num_programs(1)

    @pl.when(k == 0)
    def _():
        acc_ref[...] = jnp.zeros_like(acc_ref)

    if needs_mask:
        # Only the final chunk is ragged: keep the steady state mask-free so
        # the iota/compare/select cost (~4 VPU ops/elem) never touches the
        # HBM-bound inner loop.
        @pl.when(k < nk - 1)
        def _():
            x = x_ref[...].astype(jnp.float32)
            acc_ref[...] += jnp.sum(x, axis=1, keepdims=True)

        @pl.when(k == nk - 1)
        def _():
            x = x_ref[...].astype(jnp.float32)
            col = k * hw_tile + jax.lax.broadcasted_iota(jnp.int32, x.shape, 1)
            x = jnp.where(col < hw, x, 0.0)
            acc_ref[...] += jnp.sum(x, axis=1, keepdims=True)
    else:
        x = x_ref[...].astype(jnp.float32)
        acc_ref[...] += jnp.sum(x, axis=1, keepdims=True)

    @pl.when(k == nk - 1)
    def _():
        o_ref[...] = (acc_ref[...] * inv_hw).astype(o_ref.dtype)


def _gap_packed_kernel(x_ref, s_ref, o_ref, *, inv_hw):
    """Small-hw path: g rows packed per input row (width = g*hw <= 128).

    Per-segment sums via a tiny (g*hw, g) 0/1 matmul on the otherwise-idle MXU
    (avoids lane-splitting reshapes); output is lane-dense (row_tile, g).
    """
    x = x_ref[...].astype(jnp.float32)
    sums = jnp.dot(x, s_ref[...], preferred_element_type=jnp.float32)
    o_ref[...] = (sums * inv_hw).astype(o_ref.dtype)


def _packed_gap(x, N, C, rows, hw, g, itemsize, sub, budget, inv_hw):
    width = g * hw                       # <= 128 lanes
    prows = rows // g
    x2 = x.reshape(prows, width)         # contiguous -> free reshape

    # Segment-sum matrix: column t sums lanes [t*hw, (t+1)*hw).
    seg_ids = jnp.repeat(jnp.arange(g, dtype=jnp.int32), hw)
    s_mat = (seg_ids[:, None] == jnp.arange(g, dtype=jnp.int32)[None, :]
             ).astype(jnp.float32)

    # Padded VMEM bytes per packed row: 2 input buffers + 2 output buffers,
    # all lane-padded to 128; reserve a little for the (tiny) S-matrix blocks.
    per_row_bytes = 4 * LANE * itemsize
    row_budget = max(sub, ((budget - 256 * 1024) // per_row_bytes) // sub * sub)
    row_tile = prows if prows <= row_budget else row_budget
    if prows >= 16:
        # >= 2 blocks on the parallel axis keeps both v7x TensorCores busy.
        row_tile = min(row_tile, _round_up(_cdiv(prows, 2), sub))

    grid = (_cdiv(prows, row_tile),)

    out = pl.pallas_call(
        functools.partial(_gap_packed_kernel, inv_hw=inv_hw),
        out_shape=jax.ShapeDtypeStruct((prows, g), x.dtype),
        grid_spec=pltpu.PrefetchScalarGridSpec(
            num_scalar_prefetch=0,
            grid=grid,
            in_specs=[
                pl.BlockSpec((row_tile, width), lambda i: (i, 0)),
                pl.BlockSpec((width, g), lambda i: (0, 0)),
            ],
            out_specs=pl.BlockSpec((row_tile, g), lambda i: (i, 0)),
        ),
        compiler_params=pltpu.CompilerParams(
            dimension_semantics=("parallel",),
            vmem_limit_bytes=_VMEM_LIMIT_BYTES,
        ),
        cost_estimate=pl.CostEstimate(
            flops=2 * rows * hw,
            transcendentals=0,
            bytes_accessed=rows * hw * itemsize + rows * itemsize,
        ),
    )(x2, s_mat)

    return out.reshape(N, C, 1, 1)


def adaptive_avg_pool2d(x, output_size=(1, 1), *, block_budget_bytes=None):
    """Equivalent of F.adaptive_avg_pool2d(x, (1, 1)) for NCHW input."""
    if tuple(output_size) != (1, 1):
        # TODO(synk): general adaptive output sizes (variable pooling windows)
        # are not implemented; the module's default (1, 1) is supported.
        raise NotImplementedError("Only output_size=(1, 1) is supported.")

    N, C, H, W = x.shape
    rows = N * C
    hw = H * W
    itemsize = jnp.dtype(x.dtype).itemsize
    sub = max(8, 32 // itemsize)          # sublane granularity (8 f32, 16 bf16)
    budget = (_BLOCK_BUDGET_BYTES if block_budget_bytes is None
              else int(block_budget_bytes))
    inv_hw = float(1.0 / hw)              # Python scalar -> jaxpr literal

    # ---- Small-spatial packed path (hw < 128) -----------------------------
    g = 1
    if hw < LANE:
        for cand in range(min(LANE // hw, rows), 1, -1):
            if rows % cand == 0:
                g = cand
                break
    if g >= 2:
        return _packed_gap(x, N, C, rows, hw, g, itemsize, sub, budget, inv_hw)

    # ---- General path: (rows, hw), hw reduction on the last grid axis -----
    x2 = x.reshape(rows, hw)              # contiguous -> free reshape

    # hw chunking: cap so a minimal-row block double-buffers within ~3/4 of
    # the budget; balance chunks (multiples of 128) so at most the final one
    # is ragged (and only that one pays the mask, via pl.when gating).
    padded_hw_full = _round_up(hw, LANE)
    hw_cap = max(LANE, ((budget * 3 // 4) // (2 * sub * itemsize)) // LANE * LANE)
    if padded_hw_full <= hw_cap:
        hw_tile = hw                      # single full-width chunk
    else:
        hw_tile = _round_up(_cdiv(hw, _cdiv(hw, hw_cap)), LANE)
    needs_mask = (hw % hw_tile) != 0
    padded_hw_tile = _round_up(hw_tile, LANE)

    # Row tile from *padded* VMEM bytes: 2 input buffers + 2 lane-padded
    # (rows, 1) output buffers + the lane-padded f32 accumulator scratch.
    per_row_bytes = 2 * padded_hw_tile * itemsize + 2 * LANE * itemsize + LANE * 4
    row_budget = max(sub, (budget // per_row_bytes) // sub * sub)
    row_tile = rows if rows <= row_budget else row_budget
    if rows >= 16:
        # >= 2 blocks on the parallel row axis for v7x megacore sharding.
        row_tile = min(row_tile, _round_up(_cdiv(rows, 2), sub))

    grid = (_cdiv(rows, row_tile), _cdiv(hw, hw_tile))

    kernel = functools.partial(
        _gap_reduce_kernel,
        hw=hw, hw_tile=hw_tile, inv_hw=inv_hw, needs_mask=needs_mask)

    out = pl.pallas_call(
        kernel,
        out_shape=jax.ShapeDtypeStruct((rows, 1), x.dtype),
        grid_spec=pltpu.PrefetchScalarGridSpec(
            num_scalar_prefetch=0,
            grid=grid,
            in_specs=[pl.BlockSpec((row_tile, hw_tile), lambda i, k: (i, k))],
            out_specs=pl.BlockSpec((row_tile, 1), lambda i, k: (i, 0)),
            scratch_shapes=[pltpu.VMEM((row_tile, 1), jnp.float32)],
        ),
        compiler_params=pltpu.CompilerParams(
            dimension_semantics=("parallel", "arbitrary"),
            vmem_limit_bytes=_VMEM_LIMIT_BYTES,
        ),
        cost_estimate=pl.CostEstimate(
            flops=rows * hw,
            transcendentals=0,
            bytes_accessed=rows * hw * itemsize + rows * itemsize,
        ),
    )(x2)

    return out.reshape(N, C, 1, 1)


if __name__ == "__main__":
    key = jax.random.PRNGKey(0)

    def run_and_check(xin, **kwargs):
        y = jax.block_until_ready(adaptive_avg_pool2d(xin, **kwargs))
        ref = jnp.mean(xin, axis=(2, 3), keepdims=True)
        assert y.shape == ref.shape, (y.shape, ref.shape)
        assert jnp.allclose(y, ref, atol=1e-5, rtol=1e-5), (
            float(jnp.max(jnp.abs(y - ref))))
        return y

    k0, k1, k2 = jax.random.split(key, 3)

    # Main case (module's typical NCHW input).
    x = jax.random.normal(k0, (2, 4, 16, 16), dtype=jnp.float32)
    run_and_check(x)

    # Small-spatial packed path (hw = 49 < 128, g = 2).
    x_small = jax.random.normal(k1, (2, 4, 7, 7), dtype=jnp.float32)
    run_and_check(x_small)

    # Ragged hw-chunk path: a tiny block budget forces chunking so the
    # accumulator + gated final-chunk mask are exercised and validated.
    x_ragged = jax.random.normal(k2, (2, 4, 17, 17), dtype=jnp.float32)
    run_and_check(x_ragged, block_budget_bytes=16 * 1024)

    print("KERNEL_OK")
</pallas_src>

<mosaic_0001>
module attributes {stable_mosaic.version = 11 : i64} {
  func.func @_gap_reduce_kernel(%arg0: i32, %arg1: i32, %arg2: memref<8x256xf32, #tpu.memory_space<vmem>>, %arg3: memref<8x1xf32, #tpu.memory_space<vmem>>, %arg4: memref<8x1xf32, #tpu.memory_space<vmem>>) attributes {dimension_semantics = [#tpu.dimension_semantics<parallel>, #tpu.dimension_semantics<arbitrary>], iteration_bounds = array<i64: 1, 1>, scalar_prefetch = 0 : i64, scratch_operands = 1 : i64, tpu.core_type = #tpu.core_type<tc>, window_params = [{transform_indices = @transform_0, window_bounds = array<i64: 8, 256>}, {transform_indices = @transform_1, window_bounds = array<i64: 8, 1>}]} {
    %c0_i32 = arith.constant 0 : i32
    %0 = arith.cmpi eq, %arg1, %c0_i32 : i32
    %1 = arith.extui %0 : i1 to i32
    %c0_i32_0 = arith.constant 0 : i32
    %2 = arith.cmpi ne, %1, %c0_i32_0 : i32
    scf.if %2 {
      %cst_8 = arith.constant 0.000000e+00 : f32
      %12 = vector.broadcast %cst_8 : f32 to vector<8x1xf32>
      %c0_9 = arith.constant 0 : index
      %c0_10 = arith.constant 0 : index
      %13 = vector.load %arg4[%c0_9, %c0_10] : memref<8x1xf32, #tpu.memory_space<vmem>>, vector<8x1xf32>
      tpu.vector_store %arg4[%c0_9, %c0_10], %12 {strides = array<i32>} : memref<8x1xf32, #tpu.memory_space<vmem>>, vector<8x1xf32>,
    } else {
    }
    %c0 = arith.constant 0 : index
    %c0_1 = arith.constant 0 : index
    %3 = vector.load %arg2[%c0, %c0_1] : memref<8x256xf32, #tpu.memory_space<vmem>>, vector<8x256xf32>
    %c0_2 = arith.constant 0 : index
    %c0_3 = arith.constant 0 : index
    %4 = vector.load %arg4[%c0_2, %c0_3] : memref<8x1xf32, #tpu.memory_space<vmem>>, vector<8x1xf32>
    %cst = arith.constant dense<0.000000e+00> : vector<8xf32>
    %5 = vector.multi_reduction <add>, %3, %cst [1] : vector<8x256xf32> to vector<8xf32>
    %6 = vector.shape_cast %5 : vector<8xf32> to vector<8x1xf32>
    %7 = arith.addf %4, %6 : vector<8x1xf32>
    %c0_4 = arith.constant 0 : index
    %c0_5 = arith.constant 0 : index
    %8 = vector.load %arg4[%c0_4, %c0_5] : memref<8x1xf32, #tpu.memory_space<vmem>>, vector<8x1xf32>
    tpu.vector_store %arg4[%c0_4, %c0_5], %7 {strides = array<i32>} : memref<8x1xf32, #tpu.memory_space<vmem>>, vector<8x1xf32>,
    %c0_i32_6 = arith.constant 0 : i32
    %9 = arith.cmpi eq, %arg1, %c0_i32_6 : i32
    %10 = arith.extui %9 : i1 to i32
    %c0_i32_7 = arith.constant 0 : i32
    %11 = arith.cmpi ne, %10, %c0_i32_7 : i32
    scf.if %11 {
      %c0_8 = arith.constant 0 : index
      %c0_9 = arith.constant 0 : index
      %12 = vector.load %arg4[%c0_8, %c0_9] : memref<8x1xf32, #tpu.memory_space<vmem>>, vector<8x1xf32>
      %cst_10 = arith.constant 3.906250e-03 : f32
      %13 = vector.broadcast %cst_10 : f32 to vector<8x1xf32>
      %14 = arith.mulf %12, %13 : vector<8x1xf32>
      %c0_11 = arith.constant 0 : index
      %c0_12 = arith.constant 0 : index
      %15 = vector.load %arg3[%c0_11, %c0_12] : memref<8x1xf32, #tpu.memory_space<vmem>>, vector<8x1xf32>
      tpu.vector_store %arg3[%c0_11, %c0_12], %14 {strides = array<i32>} : memref<8x1xf32, #tpu.memory_space<vmem>>, vector<8x1xf32>,
    } else {
    }
    return
  }
  func.func @transform_0(%arg0: i32, %arg1: i32) -> (i32, i32) {
    %c0_i32 = arith.constant 0 : i32
    return %arg0, %arg1 : i32, i32
  }
  func.func @transform_1(%arg0: i32, %arg1: i32) -> (i32, i32) {
    %c0_i32 = arith.constant 0 : i32
    %c0_i32_0 = arith.constant 0 : i32
    return %arg0, %c0_i32 : i32, i32
  }
}

</mosaic_0001>

<bundles_post_ra>
// kernel: tpu_custom_call.1
= control target key start
LH: loop header
LB: loop body
LE: loop exit
PB: predicated region body
PF: predicated region fallthrough
CT: control target
= control target key end

     0   :  { %6 = vsyncpa [#allocation4], 0  ;;  %s72_s6 = smov [#allocation3]   ;;  %s99_s0 = inlined_call_operand.hbm [shape: f32[8,256], index: 0, kind: input, shape index: {}]   ;;  %s100_s1 = inlined_call_operand.vmem [shape: f32[8,1], index: 1, kind: output, shape index: {}]  }
   0x1   :  { %s13_s7 = sshll.u32 %s72_s6, 4  ;;  %s48_s10 = scalar_lea.hbm %s99_s0, 256  ;;  %s14_s7 = int_to_ptr.vmem [resolvable:$true] %s13_s7 }
   0x2   :  { %p49_p0 = scmp.ne.s32.totalorder %s99_s0, %s48_s10  ;;  %p52_p1 = scmp.lt.u32.totalorder %s48_s10, %s99_s0 }
   0x4   :  { %p54_p2 = pnand %p52_p1, %p49_p0 }
   0x6   :  { %57 = shalt.err (!%p54_p2)
}
   0x7   :  { %s58_s15 = scalar_lea.vmem %s14_s7, 256  ;;  %p63_p4 = scmp.lt.s32.totalorder %s14_s7, %s14_s7 }
   0x8   :  { %p59_p3 = scmp.ne.s32.totalorder %s14_s7, %s58_s15  ;;  %p64_p5 = scmp.lt.s32.totalorder %s58_s15, %s58_s15 }
   0xa   :  { %p65_p6 = por %p64_p5, %p63_p4 }
   0xc   :  { %p66_p7 = pnand %p65_p6, %p59_p3 }
   0xe   :  { %69 = shalt.err (!%p66_p7)
}
   0xf   :  { %16 = dma.hbm_to_vmem [thread:$0]  %s99_s0, 256, %s14_s7, [#allocation4]  }
  0x10   :  { %70 = dma.done.wait [#allocation4], 256  }
  0x11   :  { %71 = vsyncadd [#allocation4], 4294967040  ;;  %vm24_vm0 = vcmask 7168   ;;  %v73_v0 = vmov 0.0   ;;  %v26_v1 = vld [vmem:[#allocation3] sm:$0xff]  ;;  %v27_v2 = vld [vmem:[#allocation3 + $0x8] sm:$0xff] }
  0x12   :  { %25 = vst.msk [vmem:[#allocation2] sm:$0xff] %vm24_vm0, %v73_v0  ;;  %v29_v3 = vadd.f32 %v27_v2, %v26_v1 }
  0x14   :  { %30 = vadd.xlane.f32.xlu0 %v29_v3 }
  0x19   :  { %v28_v4 = vld [vmem:[#allocation2] sm:$0xff] }
  0xa1   :  { %v31_v5 = vpop.xlane.xlu0 %30 }
  0xa2   :  { %v32_v6 = vadd.f32 %v31_v5, %v28_v4 }
  0xa4   :  { %34 = vst.msk [vmem:[#allocation2] sm:$0xff] %vm24_vm0, %v32_v6 }
  0xab   :  { %v38_v7 = vld [vmem:[#allocation2] sm:$0xff] }
  0xac   :  { %v39_v8 = vmul.f32 0.00390625, %v38_v7 }
  0xae   :  { %40 = vst.msk [vmem:[%s100_s1] sm:$0xff] %vm24_vm0, %v39_v8 }
  0xaf   :  { %45 = vsyncpa [#allocation4], 1 }

</bundles_post_ra>
